<compile_context>
chip_gen: v7x
topology: tpu7x:2x2x1
jax: 0.10.0
libtpu: 0.0.40
codegen_flags: <defaults>
</compile_context>

<pallas_src>
import math
from typing import NamedTuple

import jax
import jax.numpy as jnp
from jax import lax
from jax.experimental import pallas as pl
from jax.experimental.pallas import tpu as pltpu

LANE = 128        # lane width
ROW_ALIGN = 16    # batch-tile granularity (bf16 sublane packing = 16 rows)


def _round_up(x, m):
    return (x + m - 1) // m * m


# ---------------------------------------------------------------------------
# Weight packing: PyTorch layout (out, in) -> padded (in_pad, out_pad), bf16.
# Done once per parameter update (hoisted out of the per-call path).
# ---------------------------------------------------------------------------
class PackedParams(NamedTuple):
    arrays: tuple        # interleaved (w_bf16, b_f32) pairs; heads fused at the end
    n_common: int
    obs_dim: int
    action_dim: int
    act_pad: int


def _pad_linear(w, b, in_dim, in_pad, out_pad):
    out_dim = w.shape[0]
    assert w.shape == (out_dim, in_dim), (
        f"expected PyTorch-layout weight (out={out_dim}, in={in_dim}), got {w.shape}")
    assert b.shape == (out_dim,)
    wt = jnp.zeros((in_pad, out_pad), jnp.float32)
    wt = wt.at[:in_dim, :out_dim].set(jnp.asarray(w, jnp.float32).T)
    bp = jnp.zeros((1, out_pad), jnp.float32)
    bp = bp.at[0, :out_dim].set(jnp.asarray(b, jnp.float32))
    return [wt.astype(jnp.bfloat16), bp]


def _pack_fused_head(value, adv, in_dim, in_pad, head_hidden, head_pad,
                     action_dim, act_pad):
    """Fuse value+advantage heads into two lane-dense matmuls.

    W1f: (in_pad, 2*head_pad)  ->  [h_v | h_a]
    W2f: (2*head_pad, act_pad) ->  lanes [0:action_dim]  = V (replicated) + A
                                   lane  [action_dim]    = per-row sum(A)
    """
    (wv1, bv1), (wv2, bv2) = value
    (wa1, ba1), (wa2, ba2) = adv
    assert wv1.shape == (head_hidden, in_dim) and wa1.shape == (head_hidden, in_dim)
    assert wv2.shape == (1, head_hidden) and wa2.shape == (action_dim, head_hidden)
    f32 = jnp.float32
    wv1, wa1 = jnp.asarray(wv1, f32), jnp.asarray(wa1, f32)
    wv2, wa2 = jnp.asarray(wv2, f32), jnp.asarray(wa2, f32)
    bv1, ba1 = jnp.asarray(bv1, f32), jnp.asarray(ba1, f32)
    bv2, ba2 = jnp.asarray(bv2, f32), jnp.asarray(ba2, f32)

    w1 = jnp.zeros((in_pad, 2 * head_pad), f32)
    w1 = w1.at[:in_dim, :head_hidden].set(wv1.T)
    w1 = w1.at[:in_dim, head_pad:head_pad + head_hidden].set(wa1.T)
    b1 = jnp.zeros((1, 2 * head_pad), f32)
    b1 = b1.at[0, :head_hidden].set(bv1)
    b1 = b1.at[0, head_pad:head_pad + head_hidden].set(ba1)

    w2 = jnp.zeros((2 * head_pad, act_pad), f32)
    w2 = w2.at[:head_hidden, :action_dim].set(
        jnp.broadcast_to(wv2.T, (head_hidden, action_dim)))        # V replicated
    w2 = w2.at[head_pad:head_pad + head_hidden, :action_dim].set(wa2.T)   # A
    w2 = w2.at[head_pad:head_pad + head_hidden, action_dim].set(
        jnp.sum(wa2, axis=0))                                       # row-sum(A) lane
    b2 = jnp.zeros((1, act_pad), f32)
    b2 = b2.at[0, :action_dim].set(bv2[0] + ba2)
    b2 = b2.at[0, action_dim].set(jnp.sum(ba2))

    return [w1.astype(jnp.bfloat16), b1, w2.astype(jnp.bfloat16), b2]


def pack_params(params):
    """Pack raw PyTorch-layout params once; reuse across forward calls."""
    common, value, adv = params
    obs_dim = int(common[0][0].shape[1])
    action_dim = int(adv[1][0].shape[0])
    head_hidden = int(value[0][0].shape[0])

    arrays = []
    in_dim, in_pad = obs_dim, obs_dim           # obs stays unpadded (full-dim block)
    for (w, b) in common:
        out_dim = int(w.shape[0])
        out_pad = _round_up(out_dim, LANE)
        arrays += _pad_linear(w, b, in_dim, in_pad, out_pad)
        in_dim, in_pad = out_dim, out_pad

    head_pad = _round_up(head_hidden, LANE)
    act_pad = _round_up(action_dim + 1, LANE)   # +1 lane carries per-row sum(A)
    arrays += _pack_fused_head(value, adv, in_dim, in_pad, head_hidden, head_pad,
                               action_dim, act_pad)
    return PackedParams(tuple(arrays), len(common), obs_dim, action_dim, act_pad)


# ---------------------------------------------------------------------------
# Kernel
# ---------------------------------------------------------------------------
def _make_kernel(n_common, tile_b, num_tiles, rows_in_last, has_pad, activation):
    n_param_refs = 2 * n_common + 4

    if activation == "relu":
        act = lambda x: jnp.maximum(x, 0.0)
    elif activation == "tanh":
        act = jnp.tanh
    else:
        raise ValueError(f"Activation function {activation} not recognized!")

    def dense(x, w_ref, b_ref):
        # bf16 operands on the MXU, f32 accumulation; bias/activation stay f32.
        return (jnp.dot(x.astype(jnp.bfloat16), w_ref[...],
                        preferred_element_type=jnp.float32) + b_ref[...])

    def kernel(x_ref, *refs):
        p = refs[:n_param_refs]
        q_ref = refs[n_param_refs]
        asum_ref = refs[n_param_refs + 1]

        # Common trunk.
        h = x_ref[...]
        for l in range(n_common):
            h = act(dense(h, p[2 * l], p[2 * l + 1]))

        # Fused value/advantage heads (see pack_fused_head): lanes [0:action_dim]
        # hold V + A, lane [action_dim] holds per-row sum(A), other lanes are 0.
        w1f, b1f, w2f, b2f = p[2 * n_common:2 * n_common + 4]
        hva = act(dense(h, w1f, b1f))            # (tile_b, 2*head_pad)
        q = dense(hva, w2f, b2f)                 # (tile_b, act_pad), f32
        q_ref[...] = q

        def write_partial_sum(qv):
            asum_ref[0] = jnp.sum(qv, axis=0, keepdims=True)   # (1, act_pad)

        if has_pad:
            is_last = pl.program_id(0) == num_tiles - 1

            @pl.when(jnp.logical_not(is_last))
            def _():
                write_partial_sum(q)

            @pl.when(is_last)
            def _():
                rows = lax.broadcasted_iota(jnp.int32, (tile_b, 1), 0)
                write_partial_sum(jnp.where(rows < rows_in_last, q, 0.0))
        else:
            write_partial_sum(q)

    return kernel


# ---------------------------------------------------------------------------
# Wrapper
# ---------------------------------------------------------------------------
def dueling_q_forward(obs, params, *, activation="relu", tile_b_max=512,
                      single_buffer_weights=True):
    """Dueling Q-network forward pass.

    obs:    (batch, obs_dim) array.
    params: either a PackedParams (from pack_params, preferred for repeated calls)
            or raw (common, value, advantage) lists of (weight, bias) pairs in
            PyTorch layout: weight (out, in), bias (out,).
    Returns Q values of shape (batch, action_dim).
    """
    packed = params if isinstance(params, PackedParams) else pack_params(params)
    arrays = list(packed.arrays)
    n_common = packed.n_common
    action_dim = packed.action_dim
    act_pad = packed.act_pad

    batch, obs_dim = obs.shape
    assert obs_dim == packed.obs_dim

    # --- Batch tiling: >= 2 tiles for moderate batches so the "parallel" axis
    # can shard across v7x's two TensorCores.  (On v6e, sweep tile_b_max up to
    # 1024-2048 for very large batches.)
    if batch >= 2 * ROW_ALIGN:
        tile_b = _round_up(min(tile_b_max, -(-batch // 2)), ROW_ALIGN)
    else:
        tile_b = _round_up(max(batch, 1), ROW_ALIGN)
    padded_b = _round_up(batch, tile_b)
    num_tiles = padded_b // tile_b
    has_pad = padded_b != batch
    rows_in_last = batch - (num_tiles - 1) * tile_b

    obs_b = jnp.asarray(obs, jnp.bfloat16)       # bf16 x halves the x DMA
    if has_pad:
        obs_b = jnp.pad(obs_b, ((0, padded_b - batch), (0, 0)))

    # --- Advisory cost estimate for XLA's scheduler. ---
    w_list = arrays[0::2]
    flops = 2 * padded_b * sum(int(w.shape[0]) * int(w.shape[1]) for w in w_list)
    transcendentals = (padded_b * sum(int(w.shape[1]) for w in w_list[:-1])
                       if activation == "tanh" else 0)
    weight_bytes = sum(int(a.size) * a.dtype.itemsize for a in arrays)
    bytes_accessed = int(padded_b * obs_dim * 2 + weight_bytes
                         + padded_b * act_pad * 4 + num_tiles * act_pad * 4)

    # --- Explicit VMEM budget (weights + double-buffered x/Q + live slabs). ---
    max_width = max([obs_dim] + [int(w.shape[1]) for w in w_list])
    est = (2 * weight_bytes                       # worst case (double-buffered)
           + 2 * tile_b * obs_dim * 2             # x tile, double-buffered bf16
           + 2 * tile_b * act_pad * 4             # Q tile, double-buffered f32
           + 4 * act_pad * 4                      # partial-sum blocks
           + 6 * tile_b * max_width * 4)          # live activation slabs (generous)
    vmem_limit = int(min(64 << 20, max(32 << 20, 2 * est)))

    kernel = _make_kernel(n_common, tile_b, num_tiles, rows_in_last, has_pad,
                          activation)

    out_specs = (
        pl.BlockSpec((tile_b, act_pad), lambda i: (i, 0)),       # lane-dense Q slab
        pl.BlockSpec((1, 1, act_pad), lambda i: (i, 0, 0)),      # per-tile sum row
    )
    out_shape = (
        jax.ShapeDtypeStruct((padded_b, act_pad), jnp.float32),
        jax.ShapeDtypeStruct((num_tiles, 1, act_pad), jnp.float32),
    )

    def _run(single_buffer):
        in_specs = [pl.BlockSpec((tile_b, obs_dim), lambda i: (i, 0))]
        for a in arrays:
            if single_buffer:
                # Constant index_map -> block never changes; single-buffer to
                # halve the resident-weight VMEM footprint (matters on v7x).
                in_specs.append(pl.BlockSpec(a.shape, lambda i: (0, 0),
                                             pipeline_mode=pl.Buffered(1)))
            else:
                in_specs.append(pl.BlockSpec(a.shape, lambda i: (0, 0)))
        return pl.pallas_call(
            kernel,
            grid=(num_tiles,),
            in_specs=in_specs,
            out_specs=out_specs,
            out_shape=out_shape,
            compiler_params=pltpu.CompilerParams(
                dimension_semantics=("parallel",),
                vmem_limit_bytes=vmem_limit),
            cost_estimate=pl.CostEstimate(flops=int(flops),
                                          transcendentals=int(transcendentals),
                                          bytes_accessed=bytes_accessed),
        )(obs_b, *arrays)

    use_sb = single_buffer_weights and hasattr(pl, "Buffered")
    if use_sb:
        try:
            q_raw, a_part = _run(True)
        except Exception:
            # Fallback if this JAX build rejects buffer_count=1.
            q_raw, a_part = _run(False)
    else:
        q_raw, a_part = _run(False)

    # Dueling combine epilogue (tiny XLA ops): global mean of A over all real
    # (row, action) entries, exactly like advantage_function.mean() in PyTorch.
    a_mean = jnp.sum(a_part[:, 0, action_dim]) / (batch * action_dim)
    return q_raw[:batch, :action_dim] - a_mean


# ---------------------------------------------------------------------------
# Pure-JAX references (mirror the PyTorch forward) + demo
# ---------------------------------------------------------------------------
def _ref_core(obs, params, lin, activation):
    common, value, adv = params
    act = (lambda x: jnp.maximum(x, 0.0)) if activation == "relu" else jnp.tanh
    h = jnp.asarray(obs, jnp.float32)
    for wb in common:
        h = act(lin(h, wb))
    v = lin(act(lin(h, value[0])), value[1])     # (B, 1)
    a = lin(act(lin(h, adv[0])), adv[1])         # (B, action_dim)
    return v + a - a.mean()                      # global mean, as in torch


def reference_forward(obs, params, activation="relu"):
    hi = lax.Precision.HIGHEST

    def lin(x, wb):
        w, b = wb
        return jnp.dot(x, jnp.asarray(w, jnp.float32).T, precision=hi) \
            + jnp.asarray(b, jnp.float32)

    return _ref_core(obs, params, lin, activation)


def reference_forward_bf16(obs, params, activation="relu"):
    # Emulates the kernel's numerics: bf16 dot operands, f32 accumulation.
    def lin(x, wb):
        w, b = wb
        return (jnp.dot(x.astype(jnp.bfloat16), jnp.asarray(w, jnp.bfloat16).T,
                        preferred_element_type=jnp.float32)
                + jnp.asarray(b, jnp.float32))

    return _ref_core(obs, params, lin, activation)


def init_linear(key, in_dim, out_dim):
    """PyTorch nn.Linear default init; weight in (out, in) layout."""
    kw, kb = jax.random.split(key)
    bound = 1.0 / math.sqrt(in_dim)
    w = jax.random.uniform(kw, (out_dim, in_dim), jnp.float32, -bound, bound)
    b = jax.random.uniform(kb, (out_dim,), jnp.float32, -bound, bound)
    return w, b


def _snap_bf16(x):
    return jnp.asarray(x, jnp.bfloat16).astype(jnp.float32)


def _make_params(keys, obs_dim, layersdim, action_dim):
    kiter = iter(keys)
    snap = lambda wb: (_snap_bf16(wb[0]), _snap_bf16(wb[1]))
    common, in_dim = [], obs_dim
    for ld in layersdim[:-1]:
        common.append(snap(init_linear(next(kiter), in_dim, ld)))
        in_dim = ld
    value = [snap(init_linear(next(kiter), layersdim[-2], layersdim[-1])),
             snap(init_linear(next(kiter), layersdim[-1], 1))]
    adv = [snap(init_linear(next(kiter), layersdim[-2], layersdim[-1])),
           snap(init_linear(next(kiter), layersdim[-1], action_dim))]
    return (common, value, adv)


def _check(name, obs, params, packed, **kw):
    q = jax.block_until_ready(dueling_q_forward(obs, packed, **kw))
    q_bf = reference_forward_bf16(obs, params)
    q_f32 = reference_forward(obs, params)
    assert q.shape == q_f32.shape, f"{name}: shape {q.shape} vs {q_f32.shape}"
    assert jnp.allclose(q, q_bf, atol=5e-3, rtol=5e-3), (
        f"{name}: bf16-ref max err {float(jnp.max(jnp.abs(q - q_bf)))}")
    assert jnp.allclose(q, q_f32, atol=3e-2, rtol=3e-2), (
        f"{name}: f32-ref max err {float(jnp.max(jnp.abs(q - q_f32)))}")


if __name__ == "__main__":
    key = jax.random.PRNGKey(0)
    keys = jax.random.split(key, 24)

    # Config A: obs_dim=16, layersdim=[32, 32], action_dim=4.
    params_a = _make_params(keys[:8], 16, [32, 32], 4)
    packed_a = pack_params(params_a)   # packed once, reused across calls

    obs1 = _snap_bf16(jax.random.normal(keys[8], (8, 16), jnp.float32))
    _check("single-tile", obs1, params_a, packed_a)

    # Multi-tile grid + batch-padding mask on the last tile only.
    obs2 = _snap_bf16(jax.random.normal(keys[9], (40, 16), jnp.float32))
    _check("multi-tile+pad", obs2, params_a, packed_a, tile_b_max=16)

    # Config B: two common layers, non-aligned obs_dim, two parallel tiles.
    params_b = _make_params(keys[10:18], 12, [64, 32, 32], 6)
    packed_b = pack_params(params_b)
    obs3 = _snap_bf16(jax.random.normal(keys[18], (64, 12), jnp.float32))
    _check("two-common-layers", obs3, params_b, packed_b)

    print("KERNEL_OK")
</pallas_src>

<mosaic_0001>
module attributes {stable_mosaic.version = 11 : i64} {
  func.func @kernel(%arg0: i32, %arg1: memref<16x16xbf16, #tpu.memory_space<vmem>>, %arg2: memref<16x128xbf16, #tpu.memory_space<vmem>>, %arg3: memref<1x128xf32, #tpu.memory_space<vmem>>, %arg4: memref<128x256xbf16, #tpu.memory_space<vmem>>, %arg5: memref<1x256xf32, #tpu.memory_space<vmem>>, %arg6: memref<256x128xbf16, #tpu.memory_space<vmem>>, %arg7: memref<1x128xf32, #tpu.memory_space<vmem>>, %arg8: memref<16x128xf32, #tpu.memory_space<vmem>>, %arg9: memref<1x1x128xf32, #tpu.memory_space<vmem>>) attributes {dimension_semantics = [#tpu.dimension_semantics<parallel>], iteration_bounds = array<i64: 1>, scalar_prefetch = 0 : i64, scratch_operands = 0 : i64, tpu.core_type = #tpu.core_type<tc>, window_params = [{transform_indices = @transform_0, window_bounds = array<i64: 16, 16>}, {pipeline_mode = #tpu.pipeline_mode<synchronous>, transform_indices = @transform_1, window_bounds = array<i64: 16, 128>}, {pipeline_mode = #tpu.pipeline_mode<synchronous>, transform_indices = @transform_2, window_bounds = array<i64: 1, 128>}, {pipeline_mode = #tpu.pipeline_mode<synchronous>, transform_indices = @transform_3, window_bounds = array<i64: 128, 256>}, {pipeline_mode = #tpu.pipeline_mode<synchronous>, transform_indices = @transform_4, window_bounds = array<i64: 1, 256>}, {pipeline_mode = #tpu.pipeline_mode<synchronous>, transform_indices = @transform_5, window_bounds = array<i64: 256, 128>}, {pipeline_mode = #tpu.pipeline_mode<synchronous>, transform_indices = @transform_6, window_bounds = array<i64: 1, 128>}, {transform_indices = @transform_7, window_bounds = array<i64: 16, 128>}, {transform_indices = @transform_8, window_bounds = array<i64: 1, 1, 128>}]} {
    %c0 = arith.constant 0 : index
    %c0_0 = arith.constant 0 : index
    %0 = vector.load %arg1[%c0, %c0_0] : memref<16x16xbf16, #tpu.memory_space<vmem>>, vector<16x16xbf16>
    %c0_1 = arith.constant 0 : index
    %c0_2 = arith.constant 0 : index
    %1 = vector.load %arg2[%c0_1, %c0_2] : memref<16x128xbf16, #tpu.memory_space<vmem>>, vector<16x128xbf16>
    %cst = arith.constant dense<0.000000e+00> : vector<16x128xf32>
    %2 = tpu.matmul %0, %1, %cst {dimension_numbers = #tpu.dot_dimension_numbers<[1], [0], [0], [1], [0, 0, 1, 1], [], []>} : vector<16x16xbf16>, vector<16x128xbf16>, vector<16x128xf32> -> vector<16x128xf32>
    %c0_3 = arith.constant 0 : index
    %c0_4 = arith.constant 0 : index
    %3 = vector.load %arg3[%c0_3, %c0_4] : memref<1x128xf32, #tpu.memory_space<vmem>>, vector<1x128xf32>
    %4 = vector.broadcast %3 : vector<1x128xf32> to vector<16x128xf32>
    %5 = arith.addf %2, %4 : vector<16x128xf32>
    %cst_5 = arith.constant 0.000000e+00 : f32
    %6 = vector.broadcast %cst_5 : f32 to vector<16x128xf32>
    %7 = arith.maximumf %5, %6 : vector<16x128xf32>
    %8 = arith.truncf %7 : vector<16x128xf32> to vector<16x128xbf16>
    %c0_6 = arith.constant 0 : index
    %c0_7 = arith.constant 0 : index
    %9 = vector.load %arg4[%c0_6, %c0_7] : memref<128x256xbf16, #tpu.memory_space<vmem>>, vector<128x256xbf16>
    %cst_8 = arith.constant dense<0.000000e+00> : vector<16x256xf32>
    %10 = tpu.matmul %8, %9, %cst_8 {dimension_numbers = #tpu.dot_dimension_numbers<[1], [0], [0], [1], [0, 0, 1, 1], [], []>} : vector<16x128xbf16>, vector<128x256xbf16>, vector<16x256xf32> -> vector<16x256xf32>
    %c0_9 = arith.constant 0 : index
    %c0_10 = arith.constant 0 : index
    %11 = vector.load %arg5[%c0_9, %c0_10] : memref<1x256xf32, #tpu.memory_space<vmem>>, vector<1x256xf32>
    %12 = vector.broadcast %11 : vector<1x256xf32> to vector<16x256xf32>
    %13 = arith.addf %10, %12 : vector<16x256xf32>
    %cst_11 = arith.constant 0.000000e+00 : f32
    %14 = vector.broadcast %cst_11 : f32 to vector<16x256xf32>
    %15 = arith.maximumf %13, %14 : vector<16x256xf32>
    %16 = arith.truncf %15 : vector<16x256xf32> to vector<16x256xbf16>
    %c0_12 = arith.constant 0 : index
    %c0_13 = arith.constant 0 : index
    %17 = vector.load %arg6[%c0_12, %c0_13] : memref<256x128xbf16, #tpu.memory_space<vmem>>, vector<256x128xbf16>
    %cst_14 = arith.constant dense<0.000000e+00> : vector<16x128xf32>
    %18 = tpu.matmul %16, %17, %cst_14 {dimension_numbers = #tpu.dot_dimension_numbers<[1], [0], [0], [1], [0, 0, 1, 1], [], []>} : vector<16x256xbf16>, vector<256x128xbf16>, vector<16x128xf32> -> vector<16x128xf32>
    %c0_15 = arith.constant 0 : index
    %c0_16 = arith.constant 0 : index
    %19 = vector.load %arg7[%c0_15, %c0_16] : memref<1x128xf32, #tpu.memory_space<vmem>>, vector<1x128xf32>
    %20 = vector.broadcast %19 : vector<1x128xf32> to vector<16x128xf32>
    %21 = arith.addf %18, %20 : vector<16x128xf32>
    %c0_17 = arith.constant 0 : index
    %c0_18 = arith.constant 0 : index
    %22 = vector.load %arg8[%c0_17, %c0_18] : memref<16x128xf32, #tpu.memory_space<vmem>>, vector<16x128xf32>
    tpu.vector_store %arg8[%c0_17, %c0_18], %21 {strides = array<i32>} : memref<16x128xf32, #tpu.memory_space<vmem>>, vector<16x128xf32>,
    %c0_i32 = arith.constant 0 : i32
    %23 = arith.cmpi eq, %arg0, %c0_i32 : i32
    %true = arith.constant true
    %24 = arith.xori %23, %true : i1
    %25 = arith.extui %24 : i1 to i32
    %c0_i32_19 = arith.constant 0 : i32
    %26 = arith.cmpi ne, %25, %c0_i32_19 : i32
    scf.if %26 {
      %cst_21 = arith.constant dense<0.000000e+00> : vector<128xf32>
      %29 = vector.multi_reduction <add>, %21, %cst_21 [0] : vector<16x128xf32> to vector<128xf32>
      %30 = vector.shape_cast %29 : vector<128xf32> to vector<1x128xf32>
      %c0_22 = arith.constant 0 : index
      %c0_23 = arith.constant 0 : index
      %c0_24 = arith.constant 0 : index
      %31 = vector.load %arg9[%c0_22, %c0_23, %c0_24] : memref<1x1x128xf32, #tpu.memory_space<vmem>>, vector<1x1x128xf32>
      %32 = vector.shape_cast %31 : vector<1x1x128xf32> to vector<1x128xf32>
      %33 = vector.shape_cast %30 : vector<1x128xf32> to vector<1x1x128xf32>
      tpu.vector_store %arg9[%c0_22, %c0_23, %c0_24], %33 {strides = array<i32>} : memref<1x1x128xf32, #tpu.memory_space<vmem>>, vector<1x1x128xf32>,
    } else {
    }
    %27 = arith.extui %23 : i1 to i32
    %c0_i32_20 = arith.constant 0 : i32
    %28 = arith.cmpi ne, %27, %c0_i32_20 : i32
    scf.if %28 {
      %29 = tpu.iota {dimensions = array<i32: 0>} : vector<16x1xi32>
      %c8_i32 = arith.constant 8 : i32
      %30 = vector.broadcast %c8_i32 : i32 to vector<16x1xi32>
      %31 = arith.cmpi slt, %29, %30 : vector<16x1xi32>
      %cst_21 = arith.constant 0.000000e+00 : f32
      %32 = vector.shape_cast %31 : vector<16x1xi1> to vector<16x1xi1>
      %33 = vector.broadcast %32 : vector<16x1xi1> to vector<16x128xi1>
      %34 = vector.broadcast %cst_21 : f32 to vector<16x128xf32>
      %35 = arith.select %33, %21, %34 : vector<16x128xi1>, vector<16x128xf32>
      %cst_22 = arith.constant dense<0.000000e+00> : vector<128xf32>
      %36 = vector.multi_reduction <add>, %35, %cst_22 [0] : vector<16x128xf32> to vector<128xf32>
      %37 = vector.shape_cast %36 : vector<128xf32> to vector<1x128xf32>
      %c0_23 = arith.constant 0 : index
      %c0_24 = arith.constant 0 : index
      %c0_25 = arith.constant 0 : index
      %38 = vector.load %arg9[%c0_23, %c0_24, %c0_25] : memref<1x1x128xf32, #tpu.memory_space<vmem>>, vector<1x1x128xf32>
      %39 = vector.shape_cast %38 : vector<1x1x128xf32> to vector<1x128xf32>
      %40 = vector.shape_cast %37 : vector<1x128xf32> to vector<1x1x128xf32>
      tpu.vector_store %arg9[%c0_23, %c0_24, %c0_25], %40 {strides = array<i32>} : memref<1x1x128xf32, #tpu.memory_space<vmem>>, vector<1x1x128xf32>,
    } else {
    }
    return
  }
  func.func @transform_0(%arg0: i32) -> (i32, i32) {
    %c0_i32 = arith.constant 0 : i32
    %c0_i32_0 = arith.constant 0 : i32
    return %arg0, %c0_i32 : i32, i32
  }
  func.func @transform_1(%arg0: i32) -> (i32, i32) {
    %c0_i32 = arith.constant 0 : i32
    %c0_i32_0 = arith.constant 0 : i32
    %c0_i32_1 = arith.constant 0 : i32
    return %c0_i32, %c0_i32_0 : i32, i32
  }
  func.func @transform_2(%arg0: i32) -> (i32, i32) {
    %c0_i32 = arith.constant 0 : i32
    %c0_i32_0 = arith.constant 0 : i32
    %c0_i32_1 = arith.constant 0 : i32
    return %c0_i32, %c0_i32_0 : i32, i32
  }
  func.func @transform_3(%arg0: i32) -> (i32, i32) {
    %c0_i32 = arith.constant 0 : i32
    %c0_i32_0 = arith.constant 0 : i32
    %c0_i32_1 = arith.constant 0 : i32
    return %c0_i32, %c0_i32_0 : i32, i32
  }
  func.func @transform_4(%arg0: i32) -> (i32, i32) {
    %c0_i32 = arith.constant 0 : i32
    %c0_i32_0 = arith.constant 0 : i32
    %c0_i32_1 = arith.constant 0 : i32
    return %c0_i32, %c0_i32_0 : i32, i32
  }
  func.func @transform_5(%arg0: i32) -> (i32, i32) {
    %c0_i32 = arith.constant 0 : i32
    %c0_i32_0 = arith.constant 0 : i32
    %c0_i32_1 = arith.constant 0 : i32
    return %c0_i32, %c0_i32_0 : i32, i32
  }
  func.func @transform_6(%arg0: i32) -> (i32, i32) {
    %c0_i32 = arith.constant 0 : i32
    %c0_i32_0 = arith.constant 0 : i32
    %c0_i32_1 = arith.constant 0 : i32
    return %c0_i32, %c0_i32_0 : i32, i32
  }
  func.func @transform_7(%arg0: i32) -> (i32, i32) {
    %c0_i32 = arith.constant 0 : i32
    %c0_i32_0 = arith.constant 0 : i32
    return %arg0, %c0_i32 : i32, i32
  }
  func.func @transform_8(%arg0: i32) -> (i32, i32, i32) {
    %c0_i32 = arith.constant 0 : i32
    %c0_i32_0 = arith.constant 0 : i32
    %c0_i32_1 = arith.constant 0 : i32
    return %arg0, %c0_i32, %c0_i32_0 : i32, i32, i32
  }
}

module attributes {stable_mosaic.version = 11 : i64} {
  func.func @kernel(%arg0: i32, %arg1: memref<16x16xbf16, #tpu.memory_space<vmem>>, %arg2: memref<16x128xbf16, #tpu.memory_space<vmem>>, %arg3: memref<1x128xf32, #tpu.memory_space<vmem>>, %arg4: memref<128x256xbf16, #tpu.memory_space<vmem>>, %arg5: memref<1x256xf32, #tpu.memory_space<vmem>>, %arg6: memref<256x128xbf16, #tpu.memory_space<vmem>>, %arg7: memref<1x128xf32, #tpu.memory_space<vmem>>, %arg8: memref<16x128xf32, #tpu.memory_space<vmem>>, %arg9: memref<1x1x128xf32, #tpu.memory_space<vmem>>) attributes {dimension_semantics = [#tpu.dimension_semantics<parallel>], iteration_bounds = array<i64: 1>, scalar_prefetch = 0 : i64, scratch_operands = 0 : i64, tpu.core_type = #tpu.core_type<tc>, window_params = [{transform_indices = @transform_0, window_bounds = array<i64: 16, 16>}, {pipeline_mode = #tpu.pipeline_mode<synchronous>, transform_indices = @transform_1, window_bounds = array<i64: 16, 128>}, {pipeline_mode = #tpu.pipeline_mode<synchronous>, transform_indices = @transform_2, window_bounds = array<i64: 1, 128>}, {pipeline_mode = #tpu.pipeline_mode<synchronous>, transform_indices = @transform_3, window_bounds = array<i64: 128, 256>}, {pipeline_mode = #tpu.pipeline_mode<synchronous>, transform_indices = @transform_4, window_bounds = array<i64: 1, 256>}, {pipeline_mode = #tpu.pipeline_mode<synchronous>, transform_indices = @transform_5, window_bounds = array<i64: 256, 128>}, {pipeline_mode = #tpu.pipeline_mode<synchronous>, transform_indices = @transform_6, window_bounds = array<i64: 1, 128>}, {transform_indices = @transform_7, window_bounds = array<i64: 16, 128>}, {transform_indices = @transform_8, window_bounds = array<i64: 1, 1, 128>}]} {
    %c0 = arith.constant 0 : index
    %c0_0 = arith.constant 0 : index
    %0 = vector.load %arg1[%c0, %c0_0] : memref<16x16xbf16, #tpu.memory_space<vmem>>, vector<16x16xbf16>
    %c0_1 = arith.constant 0 : index
    %c0_2 = arith.constant 0 : index
    %1 = vector.load %arg2[%c0_1, %c0_2] : memref<16x128xbf16, #tpu.memory_space<vmem>>, vector<16x128xbf16>
    %cst = arith.constant dense<0.000000e+00> : vector<16x128xf32>
    %2 = tpu.matmul %0, %1, %cst {dimension_numbers = #tpu.dot_dimension_numbers<[1], [0], [0], [1], [0, 0, 1, 1], [], []>} : vector<16x16xbf16>, vector<16x128xbf16>, vector<16x128xf32> -> vector<16x128xf32>
    %c0_3 = arith.constant 0 : index
    %c0_4 = arith.constant 0 : index
    %3 = vector.load %arg3[%c0_3, %c0_4] : memref<1x128xf32, #tpu.memory_space<vmem>>, vector<1x128xf32>
    %4 = vector.broadcast %3 : vector<1x128xf32> to vector<16x128xf32>
    %5 = arith.addf %2, %4 : vector<16x128xf32>
    %cst_5 = arith.constant 0.000000e+00 : f32
    %6 = vector.broadcast %cst_5 : f32 to vector<16x128xf32>
    %7 = arith.maximumf %5, %6 : vector<16x128xf32>
    %8 = arith.truncf %7 : vector<16x128xf32> to vector<16x128xbf16>
    %c0_6 = arith.constant 0 : index
    %c0_7 = arith.constant 0 : index
    %9 = vector.load %arg4[%c0_6, %c0_7] : memref<128x256xbf16, #tpu.memory_space<vmem>>, vector<128x256xbf16>
    %cst_8 = arith.constant dense<0.000000e+00> : vector<16x256xf32>
    %10 = tpu.matmul %8, %9, %cst_8 {dimension_numbers = #tpu.dot_dimension_numbers<[1], [0], [0], [1], [0, 0, 1, 1], [], []>} : vector<16x128xbf16>, vector<128x256xbf16>, vector<16x256xf32> -> vector<16x256xf32>
    %c0_9 = arith.constant 0 : index
    %c0_10 = arith.constant 0 : index
    %11 = vector.load %arg5[%c0_9, %c0_10] : memref<1x256xf32, #tpu.memory_space<vmem>>, vector<1x256xf32>
    %12 = vector.broadcast %11 : vector<1x256xf32> to vector<16x256xf32>
    %13 = arith.addf %10, %12 : vector<16x256xf32>
    %cst_11 = arith.constant 0.000000e+00 : f32
    %14 = vector.broadcast %cst_11 : f32 to vector<16x256xf32>
    %15 = arith.maximumf %13, %14 : vector<16x256xf32>
    %16 = arith.truncf %15 : vector<16x256xf32> to vector<16x256xbf16>
    %c0_12 = arith.constant 0 : index
    %c0_13 = arith.constant 0 : index
    %17 = vector.load %arg6[%c0_12, %c0_13] : memref<256x128xbf16, #tpu.memory_space<vmem>>, vector<256x128xbf16>
    %cst_14 = arith.constant dense<0.000000e+00> : vector<16x128xf32>
    %18 = tpu.matmul %16, %17, %cst_14 {dimension_numbers = #tpu.dot_dimension_numbers<[1], [0], [0], [1], [0, 0, 1, 1], [], []>} : vector<16x256xbf16>, vector<256x128xbf16>, vector<16x128xf32> -> vector<16x128xf32>
    %c0_15 = arith.constant 0 : index
    %c0_16 = arith.constant 0 : index
    %19 = vector.load %arg7[%c0_15, %c0_16] : memref<1x128xf32, #tpu.memory_space<vmem>>, vector<1x128xf32>
    %20 = vector.broadcast %19 : vector<1x128xf32> to vector<16x128xf32>
    %21 = arith.addf %18, %20 : vector<16x128xf32>
    %c0_17 = arith.constant 0 : index
    %c0_18 = arith.constant 0 : index
    %22 = vector.load %arg8[%c0_17, %c0_18] : memref<16x128xf32, #tpu.memory_space<vmem>>, vector<16x128xf32>
    tpu.vector_store %arg8[%c0_17, %c0_18], %21 {strides = array<i32>} : memref<16x128xf32, #tpu.memory_space<vmem>>, vector<16x128xf32>,
    %c0_i32 = arith.constant 0 : i32
    %23 = arith.cmpi eq, %arg0, %c0_i32 : i32
    %true = arith.constant true
    %24 = arith.xori %23, %true : i1
    %25 = arith.extui %24 : i1 to i32
    %c0_i32_19 = arith.constant 0 : i32
    %26 = arith.cmpi ne, %25, %c0_i32_19 : i32
    scf.if %26 {
      %cst_21 = arith.constant dense<0.000000e+00> : vector<128xf32>
      %29 = vector.multi_reduction <add>, %21, %cst_21 [0] : vector<16x128xf32> to vector<128xf32>
      %30 = vector.shape_cast %29 : vector<128xf32> to vector<1x128xf32>
      %c0_22 = arith.constant 0 : index
      %c0_23 = arith.constant 0 : index
      %c0_24 = arith.constant 0 : index
      %31 = vector.load %arg9[%c0_22, %c0_23, %c0_24] : memref<1x1x128xf32, #tpu.memory_space<vmem>>, vector<1x1x128xf32>
      %32 = vector.shape_cast %31 : vector<1x1x128xf32> to vector<1x128xf32>
      %33 = vector.shape_cast %30 : vector<1x128xf32> to vector<1x1x128xf32>
      tpu.vector_store %arg9[%c0_22, %c0_23, %c0_24], %33 {strides = array<i32>} : memref<1x1x128xf32, #tpu.memory_space<vmem>>, vector<1x1x128xf32>,
    } else {
    }
    %27 = arith.extui %23 : i1 to i32
    %c0_i32_20 = arith.constant 0 : i32
    %28 = arith.cmpi ne, %27, %c0_i32_20 : i32
    scf.if %28 {
      %29 = tpu.iota {dimensions = array<i32: 0>} : vector<16x1xi32>
      %c8_i32 = arith.constant 8 : i32
      %30 = vector.broadcast %c8_i32 : i32 to vector<16x1xi32>
      %31 = arith.cmpi slt, %29, %30 : vector<16x1xi32>
      %cst_21 = arith.constant 0.000000e+00 : f32
      %32 = vector.shape_cast %31 : vector<16x1xi1> to vector<16x1xi1>
      %33 = vector.broadcast %32 : vector<16x1xi1> to vector<16x128xi1>
      %34 = vector.broadcast %cst_21 : f32 to vector<16x128xf32>
      %35 = arith.select %33, %21, %34 : vector<16x128xi1>, vector<16x128xf32>
      %cst_22 = arith.constant dense<0.000000e+00> : vector<128xf32>
      %36 = vector.multi_reduction <add>, %35, %cst_22 [0] : vector<16x128xf32> to vector<128xf32>
      %37 = vector.shape_cast %36 : vector<128xf32> to vector<1x128xf32>
      %c0_23 = arith.constant 0 : index
      %c0_24 = arith.constant 0 : index
      %c0_25 = arith.constant 0 : index
      %38 = vector.load %arg9[%c0_23, %c0_24, %c0_25] : memref<1x1x128xf32, #tpu.memory_space<vmem>>, vector<1x1x128xf32>
      %39 = vector.shape_cast %38 : vector<1x1x128xf32> to vector<1x128xf32>
      %40 = vector.shape_cast %37 : vector<1x128xf32> to vector<1x1x128xf32>
      tpu.vector_store %arg9[%c0_23, %c0_24, %c0_25], %40 {strides = array<i32>} : memref<1x1x128xf32, #tpu.memory_space<vmem>>, vector<1x1x128xf32>,
    } else {
    }
    return
  }
  func.func @transform_0(%arg0: i32) -> (i32, i32) {
    %c0_i32 = arith.constant 0 : i32
    %c0_i32_0 = arith.constant 0 : i32
    return %arg0, %c0_i32 : i32, i32
  }
  func.func @transform_1(%arg0: i32) -> (i32, i32) {
    %c0_i32 = arith.constant 0 : i32
    %c0_i32_0 = arith.constant 0 : i32
    %c0_i32_1 = arith.constant 0 : i32
    return %c0_i32, %c0_i32_0 : i32, i32
  }
  func.func @transform_2(%arg0: i32) -> (i32, i32) {
    %c0_i32 = arith.constant 0 : i32
    %c0_i32_0 = arith.constant 0 : i32
    %c0_i32_1 = arith.constant 0 : i32
    return %c0_i32, %c0_i32_0 : i32, i32
  }
  func.func @transform_3(%arg0: i32) -> (i32, i32) {
    %c0_i32 = arith.constant 0 : i32
    %c0_i32_0 = arith.constant 0 : i32
    %c0_i32_1 = arith.constant 0 : i32
    return %c0_i32, %c0_i32_0 : i32, i32
  }
  func.func @transform_4(%arg0: i32) -> (i32, i32) {
    %c0_i32 = arith.constant 0 : i32
    %c0_i32_0 = arith.constant 0 : i32
    %c0_i32_1 = arith.constant 0 : i32
    return %c0_i32, %c0_i32_0 : i32, i32
  }
  func.func @transform_5(%arg0: i32) -> (i32, i32) {
    %c0_i32 = arith.constant 0 : i32
    %c0_i32_0 = arith.constant 0 : i32
    %c0_i32_1 = arith.constant 0 : i32
    return %c0_i32, %c0_i32_0 : i32, i32
  }
  func.func @transform_6(%arg0: i32) -> (i32, i32) {
    %c0_i32 = arith.constant 0 : i32
    %c0_i32_0 = arith.constant 0 : i32
    %c0_i32_1 = arith.constant 0 : i32
    return %c0_i32, %c0_i32_0 : i32, i32
  }
  func.func @transform_7(%arg0: i32) -> (i32, i32) {
    %c0_i32 = arith.constant 0 : i32
    %c0_i32_0 = arith.constant 0 : i32
    return %arg0, %c0_i32 : i32, i32
  }
  func.func @transform_8(%arg0: i32) -> (i32, i32, i32) {
    %c0_i32 = arith.constant 0 : i32
    %c0_i32_0 = arith.constant 0 : i32
    %c0_i32_1 = arith.constant 0 : i32
    return %arg0, %c0_i32, %c0_i32_0 : i32, i32, i32
  }
}

</mosaic_0001>

<bundles_post_ra>
// kernel: tpu_custom_call.1
= control target key start
LH: loop header
LB: loop body
LE: loop exit
PB: predicated region body
PF: predicated region fallthrough
CT: control target
= control target key end

     0   :  { %14 = vsyncpa [#allocation3], 0  ;;  %s984_s0 = inlined_call_operand.hbm [shape: bf16[16,16], index: 0, kind: input, shape index: {}]   ;;  %s985_s1 = inlined_call_operand.hbm [shape: bf16[16,128], index: 1, kind: input, shape index: {}]   ;;  %s986_s2 = inlined_call_operand.vmem [shape: f32[1,128], index: 2, kind: input, shape index: {}]   ;;  %s987_s3 = inlined_call_operand.hbm [shape: bf16[128,256], index: 3, kind: input, shape index: {}]   ;;  %s988_s4 = inlined_call_operand.vmem [shape: f32[1,256], index: 4, kind: input, shape index: {}]   ;;  %s989_s5 = inlined_call_operand.hbm [shape: bf16[256,128], index: 5, kind: input, shape index: {}]   ;;  %s990_s6 = inlined_call_operand.vmem [shape: f32[1,128], index: 6, kind: input, shape index: {}]   ;;  %s991_s7 = inlined_call_operand.hbm [shape: f32[16,128], index: 7, kind: output, shape index: {0}]   ;;  %s992_s8 = inlined_call_operand.hbm [shape: f32[1,1,128], index: 8, kind: output, shape index: {1}]  }
   0x1   :  { %15 = vsyncpa [#allocation6], 0 }
   0x2   :  { %16 = vsyncpa [#allocation9], 0 }
   0x3   :  { %17 = vsyncpa [#allocation4], 0 }
   0x4   :  { %18 = vsyncpa [#allocation12], 0  ;;  %s823_s27 = smov [#allocation5]   ;;  %s824_s29 = smov [#allocation2]  }
   0x5   :  { %s36_s28 = sshll.u32 %s823_s27, 4  ;;  %s24_s30 = sshll.u32 %s824_s29, 4  ;;  %s37_s28 = int_to_ptr.vmem [resolvable:$true] %s36_s28  ;;  %s881_s30 = int_to_ptr.vmem [resolvable:$true] %s24_s30 }
   0x6   :  { %s681_s11 = scalar_lea.hbm %s985_s1, 128 }
   0x7   :  { %p682_p0 = scmp.ne.s32.totalorder %s985_s1, %s681_s11  ;;  %p685_p1 = scmp.lt.u32.totalorder %s681_s11, %s985_s1 }
   0x9   :  { %p687_p2 = pnand %p685_p1, %p682_p0 }
   0xb   :  { %690 = shalt.err (!%p687_p2)
}
   0xc   :  { %s691_s16 = scalar_lea.vmem %s37_s28, 128  ;;  %p696_p4 = scmp.lt.s32.totalorder %s37_s28, %s37_s28 }
   0xd   :  { %p692_p3 = scmp.ne.s32.totalorder %s37_s28, %s691_s16  ;;  %p697_p5 = scmp.lt.s32.totalorder %s691_s16, %s691_s16 }
   0xf   :  { %p698_p6 = por %p697_p5, %p696_p4 }
  0x11   :  { %p699_p7 = pnand %p698_p6, %p692_p3 }
  0x13   :  { %702 = shalt.err (!%p699_p7)
}
  0x14   :  { %s825_s17 = smov 64   ;;  %s826_s18 = smov 4  }
  0x15   :  { %42 = dma.hbm_to_vmem [thread:$0]  %s985_s1, 128, %s37_s28, [#allocation6], %s825_s17, %s825_s17, %s826_s18  }
  0x16   :  { %s703_s23 = scalar_lea.hbm %s984_s0, 128 }
  0x17   :  { %p704_p8 = scmp.ne.s32.totalorder %s984_s0, %s703_s23  ;;  %p707_p9 = scmp.lt.u32.totalorder %s703_s23, %s984_s0 }
  0x19   :  { %p709_p10 = pnand %p707_p9, %p704_p8 }
  0x1b   :  { %712 = shalt.err (!%p709_p10)
}
  0x1c   :  { %s713_s29 = scalar_lea.vmem %s881_s30, 128  ;;  %p718_p12 = scmp.lt.s32.totalorder %s881_s30, %s881_s30 }
  0x1d   :  { %p714_p11 = scmp.ne.s32.totalorder %s881_s30, %s713_s29  ;;  %p719_p13 = scmp.lt.s32.totalorder %s713_s29, %s713_s29 }
  0x1f   :  { %p720_p0 = por %p719_p13, %p718_p12 }
  0x21   :  { %p721_p1 = pnand %p720_p0, %p714_p11 }
  0x23   :  { %724 = shalt.err (!%p721_p1)
}
  0x24   :  { %30 = dma.hbm_to_vmem [thread:$0]  %s984_s0, 128, %s881_s30, [#allocation3], %s825_s17, %s825_s17, %s826_s18  }
  0x25   :  { %s827_s9 = smov [#allocation7]   ;;  %s725_s13 = scalar_lea.hbm %s987_s3, 2048 }
  0x26   :  { %s50_s10 = sshll.u32 %s827_s9, 4  ;;  %p726_p2 = scmp.ne.s32.totalorder %s987_s3, %s725_s13  ;;  %s51_s10 = int_to_ptr.vmem [resolvable:$true] %s50_s10 }
  0x27   :  { %p729_p3 = scmp.lt.u32.totalorder %s725_s13, %s987_s3 }
  0x29   :  { %p731_p4 = pnand %p729_p3, %p726_p2 }
  0x2b   :  { %734 = shalt.err (!%p731_p4)
}
  0x2c   :  { %s735_s20 = scalar_lea.vmem %s51_s10, 2048  ;;  %p740_p6 = scmp.lt.s32.totalorder %s51_s10, %s51_s10 }
  0x2d   :  { %p736_p5 = scmp.ne.s32.totalorder %s51_s10, %s735_s20  ;;  %p741_p7 = scmp.lt.s32.totalorder %s735_s20, %s735_s20 }
  0x2f   :  { %p742_p8 = por %p741_p7, %p740_p6 }
  0x31   :  { %p743_p9 = pnand %p742_p8, %p736_p5 }
  0x33   :  { %746 = shalt.err (!%p743_p9)
}
  0x34   :  { %s828_s0 = smov 128   ;;  %s829_s30 = smov 8  }
  0x35   :  { %56 = dma.hbm_to_vmem [thread:$0]  %s987_s3, 2048, %s51_s10, [#allocation6], %s828_s0, %s828_s0, %s829_s30  }
  0x36   :  { %s830_s23 = smov [#allocation8]   ;;  %s747_s27 = scalar_lea.hbm %s989_s5, 2048 }
  0x37   :  { %s64_s24 = sshll.u32 %s830_s23, 4  ;;  %p748_p10 = scmp.ne.s32.totalorder %s989_s5, %s747_s27  ;;  %s65_s24 = int_to_ptr.vmem [resolvable:$true] %s64_s24 }
  0x38   :  { %p751_p11 = scmp.lt.u32.totalorder %s747_s27, %s989_s5 }
  0x3a   :  { %p753_p12 = pnand %p751_p11, %p748_p10 }
  0x3c   :  { %756 = shalt.err (!%p753_p12)
}
  0x3d   :  { %s757_s11 = scalar_lea.vmem %s65_s24, 2048  ;;  %p762_p0 = scmp.lt.s32.totalorder %s65_s24, %s65_s24 }
  0x3e   :  { %p758_p13 = scmp.ne.s32.totalorder %s65_s24, %s757_s11  ;;  %p763_p1 = scmp.lt.s32.totalorder %s757_s11, %s757_s11 }
  0x40   :  { %p764_p2 = por %p763_p1, %p762_p0 }
  0x42   :  { %p765_p3 = pnand %p764_p2, %p758_p13 }
  0x44   :  { %768 = shalt.err (!%p765_p3)
}
  0x45   :  { %70 = dma.hbm_to_vmem [thread:$0]  %s989_s5, 2048, %s65_s24, [#allocation9], %s825_s17, %s825_s17, %s826_s18  }
  0x46   :  { %813 = dma.done.wait [#allocation3], 128  }
  0x47   :  { %814 = vsyncadd [#allocation3], 4294967168 }
  0x48   :  { %815 = dma.done.wait [#allocation6], 2176  }
  0x49   :  { %816 = vsyncadd [#allocation6], 4294965120 }
  0x4a   :  { %817 = dma.done.wait [#allocation9], 2048  }
  0x4b   :  { %818 = vsyncadd [#allocation9], 4294965248  ;;  %v831_v0 = vmov 0.0   ;;  %vm832_vm0 = vmmov 0   ;;  %v639_v1 = vld [vmem:[#allocation5] sm:$0xff]   ;;  %v640_v2 = vld [vmem:[#allocation2] sm:$0xff]   ;;  %v174_v46 = vlaneseq }
  0x4c   :  { %620 = vmatprep.subr.bf16.mxu0 %v831_v0  ;;  %622 = vmatprep.mubr.msk.bf16.mxu0 %vm832_vm0, %v831_v0  ;;  %vm108_vm1 = vcmask 130048   ;;  %v641_v3 = vld [vmem:[#allocation7 + $0x4] ss:$8 sps:$4 sm:$0xff]   ;;  %v643_v4 = vld [vmem:[#allocation7] ss:$8 sps:$4 sm:$0xff]   ;;  %v833_v19 = vmov 0  }
  0x4d   :  { %621 = vmatpush3.bf16.msra.mxu0 %v639_v1  ;;  %264 = vmatprep.subr.bf16.mxu1 %v641_v3  ;;  %v644_v5 = vld [vmem:[#allocation7 + $0x14] ss:$8 sps:$4 sm:$0xff]   ;;  %v646_v6 = vld [vmem:[#allocation7 + $0x10] ss:$8 sps:$4 sm:$0xff]   ;;  %v647_v7 = vld [vmem:[#allocation7 + $0x24] ss:$8 sps:$4 sm:$0xff]  }
  0x4e   :  { %265 = vmatpush1.bf16.msra.mxu1 %v643_v4  ;;  %v649_v8 = vld [vmem:[#allocation7 + $0x20] ss:$8 sps:$4 sm:$0xff]   ;;  %v650_v9 = vld [vmem:[#allocation7 + $0x34] ss:$8 sps:$4 sm:$0xff]   ;;  %v652_v10 = vld [vmem:[#allocation7 + $0x30] ss:$8 sps:$4 sm:$0xff]   ;;  %296 = vmatprep.mubr.bf16.mxu1 %v833_v19 }
  0x4f   :  { %266 = vmatprep.subr.bf16.mxu1 %v644_v5  ;;  %v653_v11 = vld [vmem:[#allocation7 + $0x44] ss:$8 sps:$4 sm:$0xff]   ;;  %v655_v12 = vld [vmem:[#allocation7 + $0x40] ss:$8 sps:$4 sm:$0xff]   ;;  %v656_v13 = vld [vmem:[#allocation7 + $0x54] ss:$8 sps:$4 sm:$0xff]  }
  0x50   :  { %623 = vmatmul.mubr.msk.bf16.vlgmr.msra.gmra.mrb[0].mxu0 %vm108_vm1, %v640_v2  ;;  %v658_v14 = vld [vmem:[#allocation7 + $0x50] ss:$8 sps:$4 sm:$0xff]   ;;  %v659_v15 = vld [vmem:[#allocation7 + $0x64] ss:$8 sps:$4 sm:$0xff]   ;;  %v661_v16 = vld [vmem:[#allocation7 + $0x60] ss:$8 sps:$4 sm:$0xff]  }
  0x51   :  { %v662_v17 = vld [vmem:[#allocation7 + $0x74] ss:$8 sps:$4 sm:$0xff]   ;;  %v664_v18 = vld [vmem:[#allocation7 + $0x70] ss:$8 sps:$4 sm:$0xff]   ;;  %v665_v20 = vld [vmem:[#allocation8 + $0x40] sm:$0xff]   ;;  %v175_v47 = vshrl.u32 %v174_v46, 7 }
  0x52   :  { %267 = vmatpush1.bf16.msra.mxu1 %v646_v6  ;;  %v666_v21 = vld [vmem:[#allocation8] sm:$0xff]   ;;  %v667_v22 = vld [vmem:[#allocation8 + $0x48] sm:$0xff]   ;;  %598 = vmatprep.subr.bf16.mxu0 %v665_v20  ;;  %v669_v24 = vld [vmem:[#allocation8 + $0x50] sm:$0xff]   ;;  %s834_s13 = smov [#allocation10]  }
  0x53   :  { %268 = vmatprep.subr.bf16.mxu1 %v647_v7  ;;  %599 = vmatpush3.bf16.msra.mxu0 %v666_v21  ;;  %v668_v23 = vld [vmem:[#allocation8 + $0x8] sm:$0xff]   ;;  %v670_v25 = vld [vmem:[#allocation8 + $0x10] sm:$0xff]   ;;  %v671_v26 = vld [vmem:[#allocation8 + $0x58] sm:$0xff]   ;;  %v176_v48 = vsub.s32 0, %v175_v47  ;;  %v180_v50 = vsub.s32 1, %v175_v47  ;;  %s531_s14 = sshll.u32 %s834_s13, 4  ;;  %s532_s14 = int_to_ptr.vmem [resolvable:$true] %s531_s14 }
  0x54   :  { %600 = vmatprep.subr.bf16.mxu0 %v667_v22  ;;  %v672_v27 = vld [vmem:[#allocation8 + $0x18] sm:$0xff]   ;;  %v673_v28 = vld [vmem:[#allocation8 + $0x60] sm:$0xff]   ;;  %v675_v30 = vld [vmem:[#allocation8 + $0x68] sm:$0xff]   ;;  %s769_s15 = scalar_lea.vmem %s532_s14, 256  ;;  %p774_p5 = scmp.lt.s32.totalorder %s532_s14, %s532_s14 }
  0x55   :  { %v674_v29 = vld [vmem:[#allocation8 + $0x20] sm:$0xff]   ;;  %v559_v31 = vld [vmem:[%s986_s2] ss:$0 sm:$0xff]  ;;  %v676_v41 = vld [vmem:[#allocation8 + $0x28] sm:$0xff]   ;;  %p770_p4 = scmp.ne.s32.totalorder %s532_s14, %s769_s15  ;;  %p775_p6 = scmp.lt.s32.totalorder %s769_s15, %s769_s15 }
  0x56   :  { %269 = vmatpush1.bf16.msra.mxu1 %v649_v8  ;;  %v677_v42 = vld [vmem:[#allocation8 + $0x70] sm:$0xff]   ;;  %v679_v44 = vld [vmem:[#allocation8 + $0x78] sm:$0xff]  }
  0x57   :  { %270 = vmatprep.subr.bf16.mxu1 %v650_v9  ;;  %601 = vmatpush3.bf16.msra.mxu0 %v668_v23  ;;  %v678_v43 = vld [vmem:[#allocation8 + $0x30] sm:$0xff]   ;;  %v680_v45 = vld [vmem:[#allocation8 + $0x38] sm:$0xff]   ;;  %p776_p7 = por %p775_p6, %p774_p5 }
  0x58   :  { %602 = vmatprep.subr.bf16.mxu0 %v669_v24  ;;  %v172_v49 = vld [vmem:[%s988_s4] sm:$0x3] }
  0x59   :  { %v177_v51 = vrot.slane %v172_v49, %v176_v48  ;;  %v181_v52 = vrot.slane %v172_v49, %v180_v50  ;;  %v579_v4 = vld [vmem:[%s990_s6] ss:$0 sm:$0xff]  ;;  %p777_p8 = pnand %p776_p7, %p770_p4 }
  0x5a   :  { %271 = vmatpush1.bf16.msra.mxu1 %v652_v10 }
  0x5b   :  { %272 = vmatprep.subr.bf16.mxu1 %v653_v11  ;;  %603 = vmatpush3.bf16.msra.mxu0 %v670_v25 }
  0x5c   :  { %604 = vmatprep.subr.bf16.mxu0 %v671_v26 }
  0x5e   :  { %273 = vmatpush1.bf16.msra.mxu1 %v655_v12 }
  0x5f   :  { %274 = vmatprep.subr.bf16.mxu1 %v656_v13  ;;  %605 = vmatpush3.bf16.msra.mxu0 %v672_v27 }
  0x60   :  { %606 = vmatprep.subr.bf16.mxu0 %v673_v28 }
  0x62   :  { %275 = vmatpush1.bf16.msra.mxu1 %v658_v14 }
  0x63   :  { %276 = vmatprep.subr.bf16.mxu1 %v659_v15  ;;  %607 = vmatpush3.bf16.msra.mxu0 %v674_v29 }
  0x64   :  { %608 = vmatprep.subr.bf16.mxu0 %v675_v30 }
  0x66   :  { %277 = vmatpush1.bf16.msra.mxu1 %v661_v16 }
  0x67   :  { %278 = vmatprep.subr.bf16.mxu1 %v662_v17  ;;  %609 = vmatpush3.bf16.msra.mxu0 %v676_v41 }
  0x68   :  { %610 = vmatprep.subr.bf16.mxu0 %v677_v42 }
  0x6a   :  { %279 = vmatpush1.bf16.msra.mxu1 %v664_v18 }
  0x6b   :  { %611 = vmatpush3.bf16.msra.mxu0 %v678_v43 }
  0x6c   :  { %612 = vmatprep.subr.bf16.mxu0 %v679_v44 }
  0x6f   :  { %613 = vmatpush3.bf16.msra.mxu0 %v680_v45 }
 0x123   :  { %v146_v32 = vpop.f32.mrb[0].mxu0 }
 0x124   :  { %v147_v33 = vadd.f32 %v559_v31, %v146_v32  ;;  %v624_v34 = vpop.f32.mrb[1].mxu0 }
 0x125   :  { %v149_v35 = vpop.f32.mrb[2].mxu0 }
 0x126   :  { %v150_v36 = vadd.f32 %v559_v31, %v149_v35  ;;  %v625_v37 = vpop.f32.mrb[3].mxu0  ;;  %v153_v38 = vmax.f32 %v147_v33, 0.0 }
 0x128   :  { %v154_v39 = vmax.f32 %v150_v36, 0.0 }
 0x12a   :  { %v155_v40 = vpack.c.bf16 %v154_v39, %v153_v38 }
 0x12c   :  { %297 = vmatmul.mubr.bf16.vlgmr.msra.gmra.mrb[0].mxu1 %v155_v40 }
 0x1ff   :  { %v298_v53 = vpop.f32.mrb[0].mxu1 }
 0x200   :  { %v299_v54 = vadd.f32 %v298_v53, %v177_v51  ;;  %v300_v55 = vpop.f32.mrb[1].mxu1 }
 0x201   :  { %v301_v56 = vadd.f32 %v300_v55, %v181_v52  ;;  %v302_v57 = vpop.f32.mrb[2].mxu1 }
 0x202   :  { %v303_v58 = vadd.f32 %v302_v57, %v177_v51  ;;  %v304_v59 = vpop.f32.mrb[3].mxu1  ;;  %v307_v61 = vmax.f32 %v299_v54, 0.0 }
 0x203   :  { %v305_v60 = vadd.f32 %v304_v59, %v181_v52  ;;  %v308_v63 = vmax.f32 %v301_v56, 0.0 }
 0x204   :  { %v309_v62 = vmax.f32 %v303_v58, 0.0 }
 0x205   :  { %v310_v0 = vmax.f32 %v305_v60, 0.0 }
 0x206   :  { %v311_v1 = vpack.c.bf16 %v309_v62, %v307_v61 }
 0x207   :  { %v312_v2 = vpack.c.bf16 %v310_v0, %v308_v63 }
 0x209   :  { %480 = vmatprep.mubr.bf16.mxu0 %v312_v2 }
 0x20a   :  { %481 = vmatmul.mubr.bf16.vlgmr.msra.gmra.mrb[4].mxu0 %v311_v1 }
 0x2dd   :  { %v614_v3 = vpop.f32.mrb[4].mxu0 }
 0x2de   :  { %v615_v5 = vpop.f32.mrb[5].mxu0 }
 0x2df   :  { %v616_v6 = vadd.f32 %v615_v5, %v614_v3  ;;  %v617_v7 = vpop.f32.mrb[6].mxu0 }
 0x2e0   :  { %v618_v8 = vpop.f32.mrb[7].mxu0 }
 0x2e1   :  { %v483_v9 = vadd.f32 %v616_v6, %v579_v4  ;;  %v619_v10 = vadd.f32 %v618_v8, %v617_v7 }
 0x2e3   :  { %v519_v11 = vrot.slane %v483_v9, 4  ;;  %489 = vst [vmem:[#allocation10] sm:$0xff] %v483_v9  ;;  %v486_v12 = vadd.f32 %v619_v10, %v579_v4 }
 0x2e5   :  { %v520_v13 = vadd.f32 %v519_v11, %v483_v9  ;;  %490 = vst [vmem:[#allocation10 + $0x8] sm:$0xff] %v486_v12 }
 0x2e6   :  { %780 = shalt.err (!%p777_p8)
}
 0x2e7   :  { %s781_s19 = scalar_lea.hbm %s991_s7, 256 }
 0x2e8   :  { %p782_p9 = scmp.ne.s32.totalorder %s991_s7, %s781_s19  ;;  %p785_p10 = scmp.lt.u32.totalorder %s781_s19, %s991_s7 }
 0x2ea   :  { %p787_p11 = pnand %p785_p10, %p782_p9 }
 0x2ec   :  { %790 = shalt.err (!%p787_p11)
}
 0x2ed   :  { %537 = dma.vmem_to_hbm [thread:$0]  %s532_s14, 256, %s991_s7, [#allocation4], %s828_s0, %s828_s0, %s829_s30   ;;  %v521_v14 = vrot.slane %v520_v13, 2 }
 0x2ee   :  { %s835_s26 = smov [#allocation11]  }
 0x2ef   :  { %v522_v15 = vadd.f32 %v521_v14, %v520_v13  ;;  %s544_s27 = sshll.u32 %s835_s26, 4  ;;  %s545_s27 = int_to_ptr.vmem [resolvable:$true] %s544_s27 }
 0x2f0   :  { %s791_s29 = scalar_lea.vmem %s545_s27, 16  ;;  %s795_s1 = scalar_lea.vmem %s545_s27, 32 }
 0x2f1   :  { %v523_v16 = vrot.slane %v522_v15, 1  ;;  %p792_p12 = scmp.ne.s32.totalorder %s545_s27, %s791_s29  ;;  %p796_p13 = scmp.lt.s32.totalorder %s545_s27, %s545_s27 }
 0x2f2   :  { %p797_p0 = scmp.lt.s32.totalorder %s795_s1, %s791_s29 }
 0x2f3   :  { %v524_v17 = vadd.f32 %v523_v16, %v522_v15 }
 0x2f4   :  { %p798_p1 = por %p797_p0, %p796_p13 }
 0x2f5   :  { %525 = vst [vmem:[#allocation11] sm:$0x1] %v524_v17 }
 0x2f6   :  { %p799_p2 = pnand %p798_p1, %p792_p12 }
 0x2f8   :  { %802 = shalt.err (!%p799_p2)
}
 0x2f9   :  { %s803_s7 = scalar_lea.hbm %s992_s8, 16 }
 0x2fa   :  { %p804_p3 = scmp.ne.s32.totalorder %s992_s8, %s803_s7  ;;  %p807_p4 = scmp.lt.u32.totalorder %s803_s7, %s992_s8 }
 0x2fc   :  { %p809_p5 = pnand %p807_p4, %p804_p3 }
 0x2fe   :  { %812 = shalt.err (!%p809_p5)
}
 0x2ff   :  { %547 = dma.vmem_to_hbm [thread:$0]  %s545_s27, 16, %s992_s8, [#allocation12]  }
 0x300   :  { %819 = dma.done.wait [#allocation4], 256  }
 0x301   :  { %820 = vsyncadd [#allocation4], 4294967040 }
 0x302   :  { %821 = dma.done.wait [#allocation12], 16  }
 0x303   :  { %822 = vsyncadd [#allocation12], 4294967280 }
 0x304   :  { %554 = vsyncpa [#allocation3], 1 }
 0x305   :  { %555 = vsyncpa [#allocation6], 1 }
 0x306   :  { %556 = vsyncpa [#allocation9], 1 }
 0x307   :  { %557 = vsyncpa [#allocation4], 1 }
 0x308   :  { %558 = vsyncpa [#allocation12], 1 }

// kernel: tpu_custom_call.1
= control target key start
LH: loop header
LB: loop body
LE: loop exit
PB: predicated region body
PF: predicated region fallthrough
CT: control target
= control target key end

     0   :  { %14 = vsyncpa [#allocation3], 0  ;;  %s984_s0 = inlined_call_operand.hbm [shape: bf16[16,16], index: 0, kind: input, shape index: {}]   ;;  %s985_s1 = inlined_call_operand.hbm [shape: bf16[16,128], index: 1, kind: input, shape index: {}]   ;;  %s986_s2 = inlined_call_operand.vmem [shape: f32[1,128], index: 2, kind: input, shape index: {}]   ;;  %s987_s3 = inlined_call_operand.hbm [shape: bf16[128,256], index: 3, kind: input, shape index: {}]   ;;  %s988_s4 = inlined_call_operand.vmem [shape: f32[1,256], index: 4, kind: input, shape index: {}]   ;;  %s989_s5 = inlined_call_operand.hbm [shape: bf16[256,128], index: 5, kind: input, shape index: {}]   ;;  %s990_s6 = inlined_call_operand.vmem [shape: f32[1,128], index: 6, kind: input, shape index: {}]   ;;  %s991_s7 = inlined_call_operand.hbm [shape: f32[16,128], index: 7, kind: output, shape index: {0}]   ;;  %s992_s8 = inlined_call_operand.hbm [shape: f32[1,1,128], index: 8, kind: output, shape index: {1}]  }
   0x1   :  { %15 = vsyncpa [#allocation6], 0 }
   0x2   :  { %16 = vsyncpa [#allocation9], 0 }
   0x3   :  { %17 = vsyncpa [#allocation4], 0 }
   0x4   :  { %18 = vsyncpa [#allocation12], 0  ;;  %s823_s27 = smov [#allocation5]   ;;  %s824_s29 = smov [#allocation2]  }
   0x5   :  { %s36_s28 = sshll.u32 %s823_s27, 4  ;;  %s24_s30 = sshll.u32 %s824_s29, 4  ;;  %s37_s28 = int_to_ptr.vmem [resolvable:$true] %s36_s28  ;;  %s881_s30 = int_to_ptr.vmem [resolvable:$true] %s24_s30 }
   0x6   :  { %s681_s11 = scalar_lea.hbm %s985_s1, 128 }
   0x7   :  { %p682_p0 = scmp.ne.s32.totalorder %s985_s1, %s681_s11  ;;  %p685_p1 = scmp.lt.u32.totalorder %s681_s11, %s985_s1 }
   0x9   :  { %p687_p2 = pnand %p685_p1, %p682_p0 }
   0xb   :  { %690 = shalt.err (!%p687_p2)
}
   0xc   :  { %s691_s16 = scalar_lea.vmem %s37_s28, 128  ;;  %p696_p4 = scmp.lt.s32.totalorder %s37_s28, %s37_s28 }
   0xd   :  { %p692_p3 = scmp.ne.s32.totalorder %s37_s28, %s691_s16  ;;  %p697_p5 = scmp.lt.s32.totalorder %s691_s16, %s691_s16 }
   0xf   :  { %p698_p6 = por %p697_p5, %p696_p4 }
  0x11   :  { %p699_p7 = pnand %p698_p6, %p692_p3 }
  0x13   :  { %702 = shalt.err (!%p699_p7)
}
  0x14   :  { %s825_s17 = smov 64   ;;  %s826_s18 = smov 4  }
  0x15   :  { %42 = dma.hbm_to_vmem [thread:$0]  %s985_s1, 128, %s37_s28, [#allocation6], %s825_s17, %s825_s17, %s826_s18  }
  0x16   :  { %s703_s23 = scalar_lea.hbm %s984_s0, 128 }
  0x17   :  { %p704_p8 = scmp.ne.s32.totalorder %s984_s0, %s703_s23  ;;  %p707_p9 = scmp.lt.u32.totalorder %s703_s23, %s984_s0 }
  0x19   :  { %p709_p10 = pnand %p707_p9, %p704_p8 }
  0x1b   :  { %712 = shalt.err (!%p709_p10)
}
  0x1c   :  { %s713_s29 = scalar_lea.vmem %s881_s30, 128  ;;  %p718_p12 = scmp.lt.s32.totalorder %s881_s30, %s881_s30 }
  0x1d   :  { %p714_p11 = scmp.ne.s32.totalorder %s881_s30, %s713_s29  ;;  %p719_p13 = scmp.lt.s32.totalorder %s713_s29, %s713_s29 }
  0x1f   :  { %p720_p0 = por %p719_p13, %p718_p12 }
  0x21   :  { %p721_p1 = pnand %p720_p0, %p714_p11 }
  0x23   :  { %724 = shalt.err (!%p721_p1)
}
  0x24   :  { %30 = dma.hbm_to_vmem [thread:$0]  %s984_s0, 128, %s881_s30, [#allocation3], %s825_s17, %s825_s17, %s826_s18  }
  0x25   :  { %s827_s9 = smov [#allocation7]   ;;  %s725_s13 = scalar_lea.hbm %s987_s3, 2048 }
  0x26   :  { %s50_s10 = sshll.u32 %s827_s9, 4  ;;  %p726_p2 = scmp.ne.s32.totalorder %s987_s3, %s725_s13  ;;  %s51_s10 = int_to_ptr.vmem [resolvable:$true] %s50_s10 }
  0x27   :  { %p729_p3 = scmp.lt.u32.totalorder %s725_s13, %s987_s3 }
  0x29   :  { %p731_p4 = pnand %p729_p3, %p726_p2 }
  0x2b   :  { %734 = shalt.err (!%p731_p4)
}
  0x2c   :  { %s735_s20 = scalar_lea.vmem %s51_s10, 2048  ;;  %p740_p6 = scmp.lt.s32.totalorder %s51_s10, %s51_s10 }
  0x2d   :  { %p736_p5 = scmp.ne.s32.totalorder %s51_s10, %s735_s20  ;;  %p741_p7 = scmp.lt.s32.totalorder %s735_s20, %s735_s20 }
  0x2f   :  { %p742_p8 = por %p741_p7, %p740_p6 }
  0x31   :  { %p743_p9 = pnand %p742_p8, %p736_p5 }
  0x33   :  { %746 = shalt.err (!%p743_p9)
}
  0x34   :  { %s828_s0 = smov 128   ;;  %s829_s30 = smov 8  }
  0x35   :  { %56 = dma.hbm_to_vmem [thread:$0]  %s987_s3, 2048, %s51_s10, [#allocation6], %s828_s0, %s828_s0, %s829_s30  }
  0x36   :  { %s830_s23 = smov [#allocation8]   ;;  %s747_s27 = scalar_lea.hbm %s989_s5, 2048 }
  0x37   :  { %s64_s24 = sshll.u32 %s830_s23, 4  ;;  %p748_p10 = scmp.ne.s32.totalorder %s989_s5, %s747_s27  ;;  %s65_s24 = int_to_ptr.vmem [resolvable:$true] %s64_s24 }
  0x38   :  { %p751_p11 = scmp.lt.u32.totalorder %s747_s27, %s989_s5 }
  0x3a   :  { %p753_p12 = pnand %p751_p11, %p748_p10 }
  0x3c   :  { %756 = shalt.err (!%p753_p12)
}
  0x3d   :  { %s757_s11 = scalar_lea.vmem %s65_s24, 2048  ;;  %p762_p0 = scmp.lt.s32.totalorder %s65_s24, %s65_s24 }
  0x3e   :  { %p758_p13 = scmp.ne.s32.totalorder %s65_s24, %s757_s11  ;;  %p763_p1 = scmp.lt.s32.totalorder %s757_s11, %s757_s11 }
  0x40   :  { %p764_p2 = por %p763_p1, %p762_p0 }
  0x42   :  { %p765_p3 = pnand %p764_p2, %p758_p13 }
  0x44   :  { %768 = shalt.err (!%p765_p3)
}
  0x45   :  { %70 = dma.hbm_to_vmem [thread:$0]  %s989_s5, 2048, %s65_s24, [#allocation9], %s825_s17, %s825_s17, %s826_s18  }
  0x46   :  { %813 = dma.done.wait [#allocation3], 128  }
  0x47   :  { %814 = vsyncadd [#allocation3], 4294967168 }
  0x48   :  { %815 = dma.done.wait [#allocation6], 2176  }
  0x49   :  { %816 = vsyncadd [#allocation6], 4294965120 }
  0x4a   :  { %817 = dma.done.wait [#allocation9], 2048  }
  0x4b   :  { %818 = vsyncadd [#allocation9], 4294965248  ;;  %v831_v0 = vmov 0.0   ;;  %vm832_vm0 = vmmov 0   ;;  %v639_v1 = vld [vmem:[#allocation5] sm:$0xff]   ;;  %v640_v2 = vld [vmem:[#allocation2] sm:$0xff]   ;;  %v174_v46 = vlaneseq }
  0x4c   :  { %620 = vmatprep.subr.bf16.mxu0 %v831_v0  ;;  %622 = vmatprep.mubr.msk.bf16.mxu0 %vm832_vm0, %v831_v0  ;;  %vm108_vm1 = vcmask 130048   ;;  %v641_v3 = vld [vmem:[#allocation7 + $0x4] ss:$8 sps:$4 sm:$0xff]   ;;  %v643_v4 = vld [vmem:[#allocation7] ss:$8 sps:$4 sm:$0xff]   ;;  %v833_v19 = vmov 0  }
  0x4d   :  { %621 = vmatpush3.bf16.msra.mxu0 %v639_v1  ;;  %264 = vmatprep.subr.bf16.mxu1 %v641_v3  ;;  %v644_v5 = vld [vmem:[#allocation7 + $0x14] ss:$8 sps:$4 sm:$0xff]   ;;  %v646_v6 = vld [vmem:[#allocation7 + $0x10] ss:$8 sps:$4 sm:$0xff]   ;;  %v647_v7 = vld [vmem:[#allocation7 + $0x24] ss:$8 sps:$4 sm:$0xff]  }
  0x4e   :  { %265 = vmatpush1.bf16.msra.mxu1 %v643_v4  ;;  %v649_v8 = vld [vmem:[#allocation7 + $0x20] ss:$8 sps:$4 sm:$0xff]   ;;  %v650_v9 = vld [vmem:[#allocation7 + $0x34] ss:$8 sps:$4 sm:$0xff]   ;;  %v652_v10 = vld [vmem:[#allocation7 + $0x30] ss:$8 sps:$4 sm:$0xff]   ;;  %296 = vmatprep.mubr.bf16.mxu1 %v833_v19 }
  0x4f   :  { %266 = vmatprep.subr.bf16.mxu1 %v644_v5  ;;  %v653_v11 = vld [vmem:[#allocation7 + $0x44] ss:$8 sps:$4 sm:$0xff]   ;;  %v655_v12 = vld [vmem:[#allocation7 + $0x40] ss:$8 sps:$4 sm:$0xff]   ;;  %v656_v13 = vld [vmem:[#allocation7 + $0x54] ss:$8 sps:$4 sm:$0xff]  }
  0x50   :  { %623 = vmatmul.mubr.msk.bf16.vlgmr.msra.gmra.mrb[0].mxu0 %vm108_vm1, %v640_v2  ;;  %v658_v14 = vld [vmem:[#allocation7 + $0x50] ss:$8 sps:$4 sm:$0xff]   ;;  %v659_v15 = vld [vmem:[#allocation7 + $0x64] ss:$8 sps:$4 sm:$0xff]   ;;  %v661_v16 = vld [vmem:[#allocation7 + $0x60] ss:$8 sps:$4 sm:$0xff]  }
  0x51   :  { %v662_v17 = vld [vmem:[#allocation7 + $0x74] ss:$8 sps:$4 sm:$0xff]   ;;  %v664_v18 = vld [vmem:[#allocation7 + $0x70] ss:$8 sps:$4 sm:$0xff]   ;;  %v665_v20 = vld [vmem:[#allocation8 + $0x40] sm:$0xff]   ;;  %v175_v47 = vshrl.u32 %v174_v46, 7 }
  0x52   :  { %267 = vmatpush1.bf16.msra.mxu1 %v646_v6  ;;  %v666_v21 = vld [vmem:[#allocation8] sm:$0xff]   ;;  %v667_v22 = vld [vmem:[#allocation8 + $0x48] sm:$0xff]   ;;  %598 = vmatprep.subr.bf16.mxu0 %v665_v20  ;;  %v669_v24 = vld [vmem:[#allocation8 + $0x50] sm:$0xff]   ;;  %s834_s13 = smov [#allocation10]  }
  0x53   :  { %268 = vmatprep.subr.bf16.mxu1 %v647_v7  ;;  %599 = vmatpush3.bf16.msra.mxu0 %v666_v21  ;;  %v668_v23 = vld [vmem:[#allocation8 + $0x8] sm:$0xff]   ;;  %v670_v25 = vld [vmem:[#allocation8 + $0x10] sm:$0xff]   ;;  %v671_v26 = vld [vmem:[#allocation8 + $0x58] sm:$0xff]   ;;  %v176_v48 = vsub.s32 0, %v175_v47  ;;  %v180_v50 = vsub.s32 1, %v175_v47  ;;  %s531_s14 = sshll.u32 %s834_s13, 4  ;;  %s532_s14 = int_to_ptr.vmem [resolvable:$true] %s531_s14 }
  0x54   :  { %600 = vmatprep.subr.bf16.mxu0 %v667_v22  ;;  %v672_v27 = vld [vmem:[#allocation8 + $0x18] sm:$0xff]   ;;  %v673_v28 = vld [vmem:[#allocation8 + $0x60] sm:$0xff]   ;;  %v675_v30 = vld [vmem:[#allocation8 + $0x68] sm:$0xff]   ;;  %s769_s15 = scalar_lea.vmem %s532_s14, 256  ;;  %p774_p5 = scmp.lt.s32.totalorder %s532_s14, %s532_s14 }
  0x55   :  { %v674_v29 = vld [vmem:[#allocation8 + $0x20] sm:$0xff]   ;;  %v559_v31 = vld [vmem:[%s986_s2] ss:$0 sm:$0xff]  ;;  %v676_v41 = vld [vmem:[#allocation8 + $0x28] sm:$0xff]   ;;  %p770_p4 = scmp.ne.s32.totalorder %s532_s14, %s769_s15  ;;  %p775_p6 = scmp.lt.s32.totalorder %s769_s15, %s769_s15 }
  0x56   :  { %269 = vmatpush1.bf16.msra.mxu1 %v649_v8  ;;  %v677_v42 = vld [vmem:[#allocation8 + $0x70] sm:$0xff]   ;;  %v679_v44 = vld [vmem:[#allocation8 + $0x78] sm:$0xff]  }
  0x57   :  { %270 = vmatprep.subr.bf16.mxu1 %v650_v9  ;;  %601 = vmatpush3.bf16.msra.mxu0 %v668_v23  ;;  %v678_v43 = vld [vmem:[#allocation8 + $0x30] sm:$0xff]   ;;  %v680_v45 = vld [vmem:[#allocation8 + $0x38] sm:$0xff]   ;;  %p776_p7 = por %p775_p6, %p774_p5 }
  0x58   :  { %602 = vmatprep.subr.bf16.mxu0 %v669_v24  ;;  %v172_v49 = vld [vmem:[%s988_s4] sm:$0x3] }
  0x59   :  { %v177_v51 = vrot.slane %v172_v49, %v176_v48  ;;  %v181_v52 = vrot.slane %v172_v49, %v180_v50  ;;  %v579_v4 = vld [vmem:[%s990_s6] ss:$0 sm:$0xff]  ;;  %p777_p8 = pnand %p776_p7, %p770_p4 }
  0x5a   :  { %271 = vmatpush1.bf16.msra.mxu1 %v652_v10 }
  0x5b   :  { %272 = vmatprep.subr.bf16.mxu1 %v653_v11  ;;  %603 = vmatpush3.bf16.msra.mxu0 %v670_v25 }
  0x5c   :  { %604 = vmatprep.subr.bf16.mxu0 %v671_v26 }
  0x5e   :  { %273 = vmatpush1.bf16.msra.mxu1 %v655_v12 }
  0x5f   :  { %274 = vmatprep.subr.bf16.mxu1 %v656_v13  ;;  %605 = vmatpush3.bf16.msra.mxu0 %v672_v27 }
  0x60   :  { %606 = vmatprep.subr.bf16.mxu0 %v673_v28 }
  0x62   :  { %275 = vmatpush1.bf16.msra.mxu1 %v658_v14 }
  0x63   :  { %276 = vmatprep.subr.bf16.mxu1 %v659_v15  ;;  %607 = vmatpush3.bf16.msra.mxu0 %v674_v29 }
  0x64   :  { %608 = vmatprep.subr.bf16.mxu0 %v675_v30 }
  0x66   :  { %277 = vmatpush1.bf16.msra.mxu1 %v661_v16 }
  0x67   :  { %278 = vmatprep.subr.bf16.mxu1 %v662_v17  ;;  %609 = vmatpush3.bf16.msra.mxu0 %v676_v41 }
  0x68   :  { %610 = vmatprep.subr.bf16.mxu0 %v677_v42 }
  0x6a   :  { %279 = vmatpush1.bf16.msra.mxu1 %v664_v18 }
  0x6b   :  { %611 = vmatpush3.bf16.msra.mxu0 %v678_v43 }
  0x6c   :  { %612 = vmatprep.subr.bf16.mxu0 %v679_v44 }
  0x6f   :  { %613 = vmatpush3.bf16.msra.mxu0 %v680_v45 }
 0x123   :  { %v146_v32 = vpop.f32.mrb[0].mxu0 }
 0x124   :  { %v147_v33 = vadd.f32 %v559_v31, %v146_v32  ;;  %v624_v34 = vpop.f32.mrb[1].mxu0 }
 0x125   :  { %v149_v35 = vpop.f32.mrb[2].mxu0 }
 0x126   :  { %v150_v36 = vadd.f32 %v559_v31, %v149_v35  ;;  %v625_v37 = vpop.f32.mrb[3].mxu0  ;;  %v153_v38 = vmax.f32 %v147_v33, 0.0 }
 0x128   :  { %v154_v39 = vmax.f32 %v150_v36, 0.0 }
 0x12a   :  { %v155_v40 = vpack.c.bf16 %v154_v39, %v153_v38 }
 0x12c   :  { %297 = vmatmul.mubr.bf16.vlgmr.msra.gmra.mrb[0].mxu1 %v155_v40 }
 0x1ff   :  { %v298_v53 = vpop.f32.mrb[0].mxu1 }
 0x200   :  { %v299_v54 = vadd.f32 %v298_v53, %v177_v51  ;;  %v300_v55 = vpop.f32.mrb[1].mxu1 }
 0x201   :  { %v301_v56 = vadd.f32 %v300_v55, %v181_v52  ;;  %v302_v57 = vpop.f32.mrb[2].mxu1 }
 0x202   :  { %v303_v58 = vadd.f32 %v302_v57, %v177_v51  ;;  %v304_v59 = vpop.f32.mrb[3].mxu1  ;;  %v307_v61 = vmax.f32 %v299_v54, 0.0 }
 0x203   :  { %v305_v60 = vadd.f32 %v304_v59, %v181_v52  ;;  %v308_v63 = vmax.f32 %v301_v56, 0.0 }
 0x204   :  { %v309_v62 = vmax.f32 %v303_v58, 0.0 }
 0x205   :  { %v310_v0 = vmax.f32 %v305_v60, 0.0 }
 0x206   :  { %v311_v1 = vpack.c.bf16 %v309_v62, %v307_v61 }
 0x207   :  { %v312_v2 = vpack.c.bf16 %v310_v0, %v308_v63 }
 0x209   :  { %480 = vmatprep.mubr.bf16.mxu0 %v312_v2 }
 0x20a   :  { %481 = vmatmul.mubr.bf16.vlgmr.msra.gmra.mrb[4].mxu0 %v311_v1 }
 0x2dd   :  { %v614_v3 = vpop.f32.mrb[4].mxu0 }
 0x2de   :  { %v615_v5 = vpop.f32.mrb[5].mxu0 }
 0x2df   :  { %v616_v6 = vadd.f32 %v615_v5, %v614_v3  ;;  %v617_v7 = vpop.f32.mrb[6].mxu0 }
 0x2e0   :  { %v618_v8 = vpop.f32.mrb[7].mxu0 }
 0x2e1   :  { %v483_v9 = vadd.f32 %v616_v6, %v579_v4  ;;  %v619_v10 = vadd.f32 %v618_v8, %v617_v7 }
 0x2e3   :  { %v519_v11 = vrot.slane %v483_v9, 4  ;;  %489 = vst [vmem:[#allocation10] sm:$0xff] %v483_v9  ;;  %v486_v12 = vadd.f32 %v619_v10, %v579_v4 }
 0x2e5   :  { %v520_v13 = vadd.f32 %v519_v11, %v483_v9  ;;  %490 = vst [vmem:[#allocation10 + $0x8] sm:$0xff] %v486_v12 }
 0x2e6   :  { %780 = shalt.err (!%p777_p8)
}
 0x2e7   :  { %s781_s19 = scalar_lea.hbm %s991_s7, 256 }
 0x2e8   :  { %p782_p9 = scmp.ne.s32.totalorder %s991_s7, %s781_s19  ;;  %p785_p10 = scmp.lt.u32.totalorder %s781_s19, %s991_s7 }
 0x2ea   :  { %p787_p11 = pnand %p785_p10, %p782_p9 }
 0x2ec   :  { %790 = shalt.err (!%p787_p11)
}
 0x2ed   :  { %537 = dma.vmem_to_hbm [thread:$0]  %s532_s14, 256, %s991_s7, [#allocation4], %s828_s0, %s828_s0, %s829_s30   ;;  %v521_v14 = vrot.slane %v520_v13, 2 }
 0x2ee   :  { %s835_s26 = smov [#allocation11]  }
 0x2ef   :  { %v522_v15 = vadd.f32 %v521_v14, %v520_v13  ;;  %s544_s27 = sshll.u32 %s835_s26, 4  ;;  %s545_s27 = int_to_ptr.vmem [resolvable:$true] %s544_s27 }
 0x2f0   :  { %s791_s29 = scalar_lea.vmem %s545_s27, 16  ;;  %s795_s1 = scalar_lea.vmem %s545_s27, 32 }
 0x2f1   :  { %v523_v16 = vrot.slane %v522_v15, 1  ;;  %p792_p12 = scmp.ne.s32.totalorder %s545_s27, %s791_s29  ;;  %p796_p13 = scmp.lt.s32.totalorder %s545_s27, %s545_s27 }
 0x2f2   :  { %p797_p0 = scmp.lt.s32.totalorder %s795_s1, %s791_s29 }
 0x2f3   :  { %v524_v17 = vadd.f32 %v523_v16, %v522_v15 }
 0x2f4   :  { %p798_p1 = por %p797_p0, %p796_p13 }
 0x2f5   :  { %525 = vst [vmem:[#allocation11] sm:$0x1] %v524_v17 }
 0x2f6   :  { %p799_p2 = pnand %p798_p1, %p792_p12 }
 0x2f8   :  { %802 = shalt.err (!%p799_p2)
}
 0x2f9   :  { %s803_s7 = scalar_lea.hbm %s992_s8, 16 }
 0x2fa   :  { %p804_p3 = scmp.ne.s32.totalorder %s992_s8, %s803_s7  ;;  %p807_p4 = scmp.lt.u32.totalorder %s803_s7, %s992_s8 }
 0x2fc   :  { %p809_p5 = pnand %p807_p4, %p804_p3 }
 0x2fe   :  { %812 = shalt.err (!%p809_p5)
}
 0x2ff   :  { %547 = dma.vmem_to_hbm [thread:$0]  %s545_s27, 16, %s992_s8, [#allocation12]  }
 0x300   :  { %819 = dma.done.wait [#allocation4], 256  }
 0x301   :  { %820 = vsyncadd [#allocation4], 4294967040 }
 0x302   :  { %821 = dma.done.wait [#allocation12], 16  }
 0x303   :  { %822 = vsyncadd [#allocation12], 4294967280 }
 0x304   :  { %554 = vsyncpa [#allocation3], 1 }
 0x305   :  { %555 = vsyncpa [#allocation6], 1 }
 0x306   :  { %556 = vsyncpa [#allocation9], 1 }
 0x307   :  { %557 = vsyncpa [#allocation4], 1 }
 0x308   :  { %558 = vsyncpa [#allocation12], 1 }

</bundles_post_ra>
